<compile_context>
chip_gen: v7x
topology: tpu7x:2x2x1
jax: 0.10.0
libtpu: 0.0.40
codegen_flags: <defaults>
</compile_context>

<pallas_src>
import math

import jax
import jax.numpy as jnp
from jax.experimental import pallas as pl
from jax.experimental.pallas import tpu as pltpu

LANE = 128


def _round_up(v, m):
    return (v + m - 1) // m * m


def linear_kernel(x_ref, w_ref, b_ref, out_ref, sum_ref):
    # LINEAR PASS: out = x @ W_t + b.  W_t is [K, O_pad] (pre-transposed, lane-dense),
    # so the contraction is the canonical MXU form with fp32 accumulation.
    out = jnp.dot(x_ref[...], w_ref[...], preferred_element_type=jnp.float32)
    out = out + b_ref[...]                     # b_ref is (1, O_pad), broadcasts over rows
    out_ref[...] = out.astype(out_ref.dtype)   # lane-dense store (O_pad % 128 == 0)

    # Global sum of the linear output (padded columns are exactly zero: zero weight
    # columns + zero bias), one XLU reduction.  Division by the GLOBAL N happens in the
    # wrapper so this stays correct once the matmul is tiled over rows.
    sum_ref[0] = jnp.sum(out)
    # TODO(synk): at production sizes this becomes a tiled (N/tm, O/tn, K/tk) grid:
    #   fp32 VMEM accumulator with pl.when init at k==0 / store at k==last,
    #   dimension_semantics=("parallel","parallel","arbitrary") (uses both TCs on v7x),
    #   bf16 MXU operands (f32 accumulate) on v6e/v7x, tiles sized for 64 MiB VMEM on
    #   v7x (e.g. 256x256x512 bf16 double-buffered, vmem_limit_bytes set explicitly),
    #   128-multiple tiles + f32-only elementwise on v5e, and the threshold accumulated
    #   from per-tile partial sums in a tiny epilogue.


def indicator_kernel(thr_ref, mask_ref, hi_ref):
    # MASK INDICES (indicator only): mask > threshold.  threshold arrives as an SMEM
    # scalar; the indicator is int8 and lane-dense (M2 padded to a 128-multiple).
    hi_ref[...] = (mask_ref[...] > thr_ref[0]).astype(jnp.int8)


def prepare_params(weight, bias):
    """One-time (init-time) re-layout of the Linear parameters, outside the hot path.

    weight: [O, K] (PyTorch-native) -> [K, O_pad] f32, zero-padded so the output feature
    dim sits on lanes and is a 128-multiple.  bias: [O] -> (1, O_pad).
    """
    O, K = weight.shape
    o_pad = _round_up(O, LANE)
    w_t = jnp.zeros((K, o_pad), jnp.float32).at[:, :O].set(weight.T.astype(jnp.float32))
    b_p = jnp.zeros((1, o_pad), jnp.float32).at[0, :O].set(bias.astype(jnp.float32))
    return w_t, b_p


def mymodule_forward(x, w_t, b_p, mask, out_features):
    """x: [N, K] f32, w_t: [K, O_pad] f32 (prepared), b_p: [1, O_pad] f32,
    mask: [M1, M2] f32.  Returns (out [N, O], threshold scalar, hi_idx [hits, 2])."""
    N, K = x.shape
    o_pad = w_t.shape[1]
    O = out_features

    # ---- LINEAR PASS -------------------------------------------------------
    # Single-invocation kernel (grid=()): the toy shapes fit one VMEM block, so there is
    # no per-step pipeline bookkeeping.  See TODO(synk) in the kernel for the tiled plan.
    out_p, total = pl.pallas_call(
        linear_kernel,
        out_shape=(
            jax.ShapeDtypeStruct((N, o_pad), jnp.float32),
            jax.ShapeDtypeStruct((1,), jnp.float32),
        ),
        in_specs=[
            pl.BlockSpec(memory_space=pltpu.MemorySpace.VMEM),   # x [N, K]
            pl.BlockSpec(memory_space=pltpu.MemorySpace.VMEM),   # w_t [K, O_pad]
            pl.BlockSpec(memory_space=pltpu.MemorySpace.VMEM),   # bias (1, O_pad)
        ],
        out_specs=(
            pl.BlockSpec(memory_space=pltpu.MemorySpace.VMEM),   # out (lane-dense)
            pl.BlockSpec(memory_space=pltpu.MemorySpace.SMEM),   # global sum scalar
        ),
        cost_estimate=pl.CostEstimate(
            flops=2 * N * K * o_pad,
            transcendentals=0,
            bytes_accessed=4 * (N * K + K * o_pad + o_pad + N * o_pad + 1),
        ),
    )(x, w_t, b_p)
    out = out_p[:, :O]

    # threshold = out.sum(axis=1).mean() == sum(out) / N, using the GLOBAL N.
    thr = total[0] * (1.0 / N)

    # ---- MASK INDICES ------------------------------------------------------
    M1, M2 = mask.shape
    m2_pad = _round_up(M2, LANE)
    # Per-call pad to a lane-dense layout; at production sizes store the mask pre-padded
    # (or pick M2 as a 128-multiple) so this pad disappears from the hot path.
    mask_p = jnp.pad(mask, ((0, 0), (0, m2_pad - M2)))

    hi_p = pl.pallas_call(
        indicator_kernel,
        out_shape=jax.ShapeDtypeStruct((M1, m2_pad), jnp.int8),
        in_specs=[
            pl.BlockSpec(memory_space=pltpu.MemorySpace.SMEM),   # threshold scalar (1,)
            pl.BlockSpec(memory_space=pltpu.MemorySpace.VMEM),   # mask (lane-dense)
        ],
        out_specs=pl.BlockSpec(memory_space=pltpu.MemorySpace.VMEM),
    )(thr.reshape(1), mask_p)

    # np.argwhere has a data-dependent output shape -> done eagerly outside the kernel on
    # the kernel-produced indicator (matches torch: [num_hits, mask.ndim]).
    # TODO(synk): if this wrapper is ever jitted / inside a loop, switch to
    # jnp.nonzero(hi, size=static_bound) to avoid a host sync per call.
    hi_idx = jnp.argwhere(hi_p[:, :M2] > 0)
    return out, thr, hi_idx


if __name__ == "__main__":
    # Small shapes consistent with the module: batch=8, in_features=32, out_features=16.
    N, IN_F, OUT_F = 8, 32, 16
    M1, M2 = 8, 16

    key = jax.random.PRNGKey(0)
    kx, kw, kb, km = jax.random.split(key, 4)

    # Deterministic parameter init (PyTorch Linear-style uniform(-1/sqrt(in), 1/sqrt(in))).
    bound = 1.0 / math.sqrt(IN_F)
    weight = jax.random.uniform(kw, (OUT_F, IN_F), jnp.float32, -bound, bound)
    bias = jax.random.uniform(kb, (OUT_F,), jnp.float32, -bound, bound)

    x = jax.random.normal(kx, (N, IN_F), jnp.float32)
    mask = jax.random.normal(km, (M1, M2), jnp.float32)

    # One-time weight re-layout (init time, outside the hot path).
    w_t, b_p = prepare_params(weight, bias)

    out, thr, hi_idx = mymodule_forward(x, w_t, b_p, mask, OUT_F)
    jax.block_until_ready(out)
    jax.block_until_ready(thr)
    jax.block_until_ready(hi_idx)

    # Reference check against plain JAX.
    ref_out = x @ weight.T + bias
    ref_thr = jnp.mean(jnp.sum(ref_out, axis=1))
    ref_idx = jnp.argwhere(mask > ref_thr)
    assert jnp.allclose(out, ref_out, atol=1e-5, rtol=1e-5)
    assert jnp.allclose(thr, ref_thr, atol=1e-5, rtol=1e-5)
    assert hi_idx.shape == ref_idx.shape and bool(jnp.all(hi_idx == ref_idx))

    print("KERNEL_OK")
</pallas_src>

<mosaic_0001>
module attributes {stable_mosaic.version = 11 : i64} {
  func.func @linear_kernel(%arg0: memref<8x32xf32, #tpu.memory_space<vmem>>, %arg1: memref<32x128xf32, #tpu.memory_space<vmem>>, %arg2: memref<1x128xf32, #tpu.memory_space<vmem>>, %arg3: memref<8x128xf32, #tpu.memory_space<vmem>>, %arg4: memref<1xf32, #tpu.memory_space<smem>>) attributes {dimension_semantics = [], scalar_prefetch = 0 : i64, scratch_operands = 0 : i64, tpu.core_type = #tpu.core_type<tc>} {
    %c0 = arith.constant 0 : index
    %c0_0 = arith.constant 0 : index
    %0 = vector.load %arg0[%c0, %c0_0] : memref<8x32xf32, #tpu.memory_space<vmem>>, vector<8x32xf32>
    %c0_1 = arith.constant 0 : index
    %c0_2 = arith.constant 0 : index
    %1 = vector.load %arg1[%c0_1, %c0_2] : memref<32x128xf32, #tpu.memory_space<vmem>>, vector<32x128xf32>
    %cst = arith.constant dense<0.000000e+00> : vector<8x128xf32>
    %2 = tpu.matmul %0, %1, %cst {dimension_numbers = #tpu.dot_dimension_numbers<[1], [0], [0], [1], [0, 0, 1, 1], [], []>} : vector<8x32xf32>, vector<32x128xf32>, vector<8x128xf32> -> vector<8x128xf32>
    %c0_3 = arith.constant 0 : index
    %c0_4 = arith.constant 0 : index
    %3 = vector.load %arg2[%c0_3, %c0_4] : memref<1x128xf32, #tpu.memory_space<vmem>>, vector<1x128xf32>
    %4 = vector.broadcast %3 : vector<1x128xf32> to vector<8x128xf32>
    %5 = arith.addf %2, %4 : vector<8x128xf32>
    %c0_5 = arith.constant 0 : index
    %c0_6 = arith.constant 0 : index
    %6 = vector.load %arg3[%c0_5, %c0_6] : memref<8x128xf32, #tpu.memory_space<vmem>>, vector<8x128xf32>
    tpu.vector_store %arg3[%c0_5, %c0_6], %5 {strides = array<i32>} : memref<8x128xf32, #tpu.memory_space<vmem>>, vector<8x128xf32>,
    %7 = vector.shape_cast %5 : vector<8x128xf32> to vector<1x8x128xf32>
    %cst_7 = arith.constant dense<0.000000e+00> : vector<1xf32>
    %8 = vector.multi_reduction <add>, %7, %cst_7 [1, 2] : vector<1x8x128xf32> to vector<1xf32>
    %9 = vector.shape_cast %8 : vector<1xf32> to vector<1x1x1xf32>
    %10 = vector.extract %9[0, 0, 0] : f32 from vector<1x1x1xf32>
    %c0_8 = arith.constant 0 : index
    %11 = memref.load %arg4[%c0_8] : memref<1xf32, #tpu.memory_space<smem>>
    memref.store %10, %arg4[%c0_8] : memref<1xf32, #tpu.memory_space<smem>>
    return
  }
}

</mosaic_0001>

<bundles_post_ra>
// kernel: tpu_custom_call.1
= control target key start
LH: loop header
LB: loop body
LE: loop exit
PB: predicated region body
PF: predicated region fallthrough
CT: control target
= control target key end

     0   :  { %10 = vsyncpa [#allocation3], 0  ;;  %s382_s0 = inlined_call_operand.hbm [shape: f32[8,32], index: 0, kind: input, shape index: {}]   ;;  %s383_s1 = inlined_call_operand.hbm [shape: f32[32,128], index: 1, kind: input, shape index: {}]   ;;  %s384_s2 = inlined_call_operand.vmem [shape: f32[1,128], index: 2, kind: input, shape index: {}]   ;;  %s385_s3 = inlined_call_operand.hbm [shape: f32[8,128], index: 3, kind: output, shape index: {0}]   ;;  %s386_s4 = inlined_call_operand.hbm [shape: f32[1], index: 4, kind: output, shape index: {1}]  }
   0x1   :  { %11 = vsyncpa [#allocation7], 0 }
   0x2   :  { %12 = vsyncpa [#allocation4], 0 }
   0x3   :  { %13 = vsyncpa [#allocation5], 0  ;;  %s290_s15 = smov [#allocation2]   ;;  %s291_s17 = smov [#allocation6]  }
   0x4   :  { %s20_s16 = sshll.u32 %s290_s15, 4  ;;  %s29_s18 = sshll.u32 %s291_s17, 4  ;;  %s21_s16 = int_to_ptr.vmem [resolvable:$true] %s20_s16  ;;  %s324_s18 = int_to_ptr.vmem [resolvable:$true] %s29_s18 }
   0x5   :  { %s206_s21 = scalar_lea.hbm %s382_s0, 128 }
   0x6   :  { %p207_p0 = scmp.ne.s32.totalorder %s382_s0, %s206_s21  ;;  %p210_p1 = scmp.lt.u32.totalorder %s206_s21, %s382_s0 }
   0x8   :  { %p212_p2 = pnand %p210_p1, %p207_p0 }
   0xa   :  { %215 = shalt.err (!%p212_p2)
}
   0xb   :  { %s216_s26 = scalar_lea.vmem %s21_s16, 128  ;;  %p221_p4 = scmp.lt.s32.totalorder %s21_s16, %s21_s16 }
   0xc   :  { %p217_p3 = scmp.ne.s32.totalorder %s21_s16, %s216_s26  ;;  %p222_p5 = scmp.lt.s32.totalorder %s216_s26, %s216_s26 }
   0xe   :  { %p223_p6 = por %p222_p5, %p221_p4 }
  0x10   :  { %p224_p7 = pnand %p223_p6, %p217_p3 }
  0x12   :  { %227 = shalt.err (!%p224_p7)
}
  0x13   :  { %23 = dma.hbm_to_vmem [thread:$0]  %s382_s0, 128, %s21_s16, [#allocation3]  }
  0x14   :  { %s228_s5 = scalar_lea.hbm %s383_s1, 512 }
  0x15   :  { %p229_p8 = scmp.ne.s32.totalorder %s383_s1, %s228_s5  ;;  %p232_p9 = scmp.lt.u32.totalorder %s228_s5, %s383_s1 }
  0x17   :  { %p234_p10 = pnand %p232_p9, %p229_p8 }
  0x19   :  { %237 = shalt.err (!%p234_p10)
}
  0x1a   :  { %s238_s10 = scalar_lea.vmem %s324_s18, 512  ;;  %p243_p12 = scmp.lt.s32.totalorder %s324_s18, %s324_s18 }
  0x1b   :  { %p239_p11 = scmp.ne.s32.totalorder %s324_s18, %s238_s10  ;;  %p244_p13 = scmp.lt.s32.totalorder %s238_s10, %s238_s10 }
  0x1d   :  { %p245_p0 = por %p244_p13, %p243_p12 }
  0x1f   :  { %p246_p1 = pnand %p245_p0, %p239_p11 }
  0x21   :  { %249 = shalt.err (!%p246_p1)
}
  0x22   :  { %s292_s0 = smov 128   ;;  %s293_s11 = smov 8  }
  0x23   :  { %35 = dma.hbm_to_vmem [thread:$0]  %s383_s1, 512, %s324_s18, [#allocation7], %s292_s0, %s292_s0, %s293_s11  }
  0x24   :  { %282 = dma.done.wait [#allocation3], 128  }
  0x25   :  { %283 = vsyncadd [#allocation3], 4294967168 }
  0x26   :  { %284 = dma.done.wait [#allocation7], 512  }
  0x27   :  { %285 = vsyncadd [#allocation7], 4294966784  ;;  %v294_v0 = vmov 0.0|0.0   ;;  %vm295_vm0 = vmmov 0   ;;  %v296_v1 = vmov 0.0   ;;  %v45_v2 = vld [vmem:[#allocation6] sm:$0xff] }
  0x28   :  { %189 = vmatprep.subr.bf16.mxu0 %v294_v0  ;;  %186 = vmatprep.mubr.msk.f32.mxu0 %vm295_vm0, %v296_v1  ;;  %v46_v3 = vld [vmem:[#allocation6 + $0x8] sm:$0xff]  ;;  %v47_v4 = vld [vmem:[#allocation6 + $0x10] sm:$0xff]  ;;  %v48_v6 = vld [vmem:[#allocation6 + $0x18] sm:$0xff]  ;;  %vm56_vm1 = vcmask 261120   ;;  %s297_s15 = smov [#allocation8]  }
  0x29   :  { %v190_v5 = vpack.c.bf16 %v46_v3, %v45_v2  ;;  %v193_v7 = vpack.c.bf16 %v48_v6, %v47_v4  ;;  %v44_v8 = vld [vmem:[#allocation2] sm:$0xff]  ;;  %s148_s16 = sshll.u32 %s297_s15, 4  ;;  %s149_s16 = int_to_ptr.vmem [resolvable:$true] %s148_s16 }
  0x2a   :  { %v171_v9 = vld [vmem:[%s384_s2] ss:$0 sm:$0xff]  ;;  %s250_s17 = scalar_lea.vmem %s149_s16, 128  ;;  %p255_p3 = scmp.lt.s32.totalorder %s149_s16, %s149_s16 }
  0x2b   :  { %191 = vmatpush3.bf16.msra.mxu0 %v190_v5  ;;  %p251_p2 = scmp.ne.s32.totalorder %s149_s16, %s250_s17  ;;  %p256_p4 = scmp.lt.s32.totalorder %s250_s17, %s250_s17 }
  0x2c   :  { %192 = vmatprep.subr.bf16.mxu0 %v294_v0 }
  0x2d   :  { %p257_p5 = por %p256_p4, %p255_p3 }
  0x2f   :  { %194 = vmatpush3.bf16.msra.mxu0 %v193_v7  ;;  %p258_p6 = pnand %p257_p5, %p251_p2 }
  0x32   :  { %187 = vmatmul.mubr.msk.f32.vlgmr.msra.gmra.mrb[0].mxu0 %vm56_vm1, %v44_v8 }
 0x105   :  { %v126_v10 = vpop.f32.mrb[0].mxu0 }
 0x106   :  { %v127_v11 = vadd.f32 %v171_v9, %v126_v10  ;;  %v188_v12 = vpop.f32.mrb[1].mxu0 }
 0x108   :  { %130 = vst [vmem:[#allocation8] sm:$0xff] %v127_v11  ;;  %131 = vadd.xlane.f32.xlu0 %v127_v11 }
 0x109   :  { %261 = shalt.err (!%p258_p6)
}
 0x10a   :  { %s262_s20 = scalar_lea.hbm %s385_s3, 128 }
 0x10b   :  { %p263_p7 = scmp.ne.s32.totalorder %s385_s3, %s262_s20  ;;  %p266_p8 = scmp.lt.u32.totalorder %s262_s20, %s385_s3 }
 0x10d   :  { %p268_p9 = pnand %p266_p8, %p263_p7 }
 0x10f   :  { %271 = shalt.err (!%p268_p9)
}
 0x110   :  { %151 = dma.vmem_to_hbm [thread:$0]  %s149_s16, 128, %s385_s3, [#allocation4]  }
 0x111   :  { %s272_s29 = scalar_lea.hbm %s386_s4, 16 }
 0x112   :  { %p273_p10 = scmp.ne.s32.totalorder %s386_s4, %s272_s29  ;;  %p276_p11 = scmp.lt.u32.totalorder %s272_s29, %s386_s4 }
 0x114   :  { %p278_p12 = pnand %p276_p11, %p273_p10 }
 0x195   :  { %v132_v13 = vpop.xlane.xlu0 %131 }
 0x196   :  { %v133_v14 = vrot.slane %v132_v13, 4 }
 0x198   :  { %v134_v15 = vadd.f32 %v133_v14, %v132_v13 }
 0x19a   :  { %v135_v16 = vrot.slane %v134_v15, 2 }
 0x19c   :  { %v136_v17 = vadd.f32 %v135_v16, %v134_v15 }
 0x19e   :  { %v137_v18 = vrot.slane %v136_v17, 1 }
 0x1a0   :  { %v138_v19 = vadd.f32 %v137_v18, %v136_v17 }
 0x1a2   :  { %195 = vpush %v138_v19 }
 0x1d3   :  { %s196_s26 = spop %195 }
 0x1d4   :  { %141 = sst [smem:[#allocation9]] %s196_s26 }
 0x1d5   :  { %281 = shalt.err (!%p278_p12)
}
 0x1d6   :  { %s298_s7 = smov [#allocation9]  }
 0x1d7   :  { %159 = dma.smem_to_hbm %s298_s7, 16, %s386_s4, [#allocation5]  }
 0x1d8   :  { %286 = dma.done.wait [#allocation4], 128  }
 0x1d9   :  { %287 = vsyncadd [#allocation4], 4294967168 }
 0x1da   :  { %288 = dma.done.wait [#allocation5], 16  }
 0x1db   :  { %289 = vsyncadd [#allocation5], 4294967280 }
 0x1dc   :  { %166 = sfence }
 0x1dd   :  { %167 = vsyncpa [#allocation3], 1 }
 0x1de   :  { %168 = vsyncpa [#allocation7], 1 }
 0x1df   :  { %169 = vsyncpa [#allocation4], 1 }
 0x1e0   :  { %170 = vsyncpa [#allocation5], 1 }

</bundles_post_ra>
